<compile_context>
chip_gen: v5e
topology: v5e:2x2
jax: 0.10.0
libtpu: 0.0.40
codegen_flags: <defaults>
</compile_context>

<pallas_src>
import math

import jax
import jax.numpy as jnp
from jax.experimental import pallas as pl
from jax.experimental.pallas import tpu as pltpu  # noqa: F401  (TPU backend import)

D = 32          # embedding_dim
ATT_H = 16      # hidden width of the AttentionLayer MLP
ETA = 0.5       # self.eta
NUM_USERS = 12
NUM_GROUPS = 6


# ----------------------------------------------------------------------------
# Fused kernel: block-diagonal member self-attention + AttentionLayer weighting
#               + mask2 mixing + final eta-mix.  Single invocation, no grid.
# ----------------------------------------------------------------------------
def _fused_han_kernel(menb_ref, m1c_ref, bm_ref, sel_ref, nue_ref, mask2_ref, ufull_ref,
                      wqkv_ref, bqkv_ref, w1_ref, b1_ref, w2_ref, b2_ref, out_ref):
    d = menb_ref.shape[-1]
    m1 = m1c_ref[...]                                    # (GM, 1) member-valid column mask
    x = menb_ref[...] * m1                               # (GM, D) masked member embeddings

    # Single fused Q|K|V projection: one (GM, D) @ (D, 3D) MXU matmul.
    qkv = jnp.dot(x, wqkv_ref[...], preferred_element_type=jnp.float32) + bqkv_ref[...]
    q = qkv[:, :d] * m1
    k = qkv[:, d:2 * d] * m1
    v = qkv[:, 2 * d:3 * d]

    # Block-diagonal energy: cross-group / padded-key entries are zeroed by bm_ref.
    energy = jax.lax.dot_general(
        q, k, dimension_numbers=(((1,), (1,)), ((), ())),
        preferred_element_type=jnp.float32) * (1.0 / math.sqrt(d))
    energy = jnp.clip(energy, -50.0, 50.0)
    e = jnp.exp(energy) * bm_ref[...]                    # (GM, GM)
    sm = e * pl.reciprocal(jnp.sum(e, axis=-1, keepdims=True), approx=True)
    o = jnp.dot(sm, v, preferred_element_type=jnp.float32)          # (GM, D)

    # Per-group pick of target-user rows (mask1 * (menb_id == target)) and sum over members.
    user_out = jnp.dot(sel_ref[...], o, preferred_element_type=jnp.float32)   # (G, D)
    overall = 0.5 * user_out + 0.5 * nue_ref[...]        # literal 0.5, as in the reference

    # AttentionLayer (attention_u): Linear(D,16) -> ReLU -> Linear(16,1) -> softmax over G.
    h = jnp.maximum(
        jnp.dot(overall, w1_ref[...], preferred_element_type=jnp.float32) + b1_ref[...], 0.0)
    scores = jnp.sum(h * w2_ref[...], axis=-1, keepdims=True) + b2_ref[...]   # (G, 1)
    scores = scores - jnp.max(scores, axis=0, keepdims=True)
    e2 = jnp.exp(scores)
    w = e2 * pl.reciprocal(jnp.sum(e2, axis=0, keepdims=True), approx=True)   # (G, 1)

    # (mask2 * w^T) @ overall / rowsum(mask2 * w^T)  ==  (mask2 @ (w*overall)) / (mask2 @ w)
    num = jnp.dot(mask2_ref[...], w * overall, preferred_element_type=jnp.float32)   # (B, D)
    den = jnp.dot(mask2_ref[...], w, preferred_element_type=jnp.float32)             # (B, 1)
    den = jnp.maximum(den, 1e-30)   # guard: a user with no group would otherwise give NaN
    g_emb = num * pl.reciprocal(den, approx=True)

    out_ref[...] = ETA * g_emb + (1.0 - ETA) * ufull_ref[...]


@jax.jit
def _han_forward_arrays(u2e_w, user_ids, menb_ids, mask1, new_user_ids,
                        wqkv, bqkv, w1, b1, w2, b2):
    """Gathers, mask construction and the fused pallas_call, all in one XLA program."""
    G, M = menb_ids.shape
    GM = G * M
    Bsz = user_ids.shape[0]
    d = u2e_w.shape[1]

    # Embedding gathers (fused in the same jit as the kernel -> no extra HBM round-trip).
    ufull = u2e_w[user_ids]                          # (B, D)   user_embeds_full
    menb_flat = u2e_w[menb_ids.reshape(GM)]          # (GM, D)  stacked member embeddings
    nue = u2e_w[new_user_ids]                        # (G, D)   new_user_embeds

    # Masks (2-D, lane/sublane friendly; consumed directly by the kernel).
    mask_eq = (menb_ids == new_user_ids[:, None]).astype(jnp.float32)        # (G, M)
    m1flat = mask1.reshape(GM)
    m1col = m1flat.reshape(GM, 1)                                            # (GM, 1)
    col_group = jnp.repeat(jnp.arange(G, dtype=jnp.int32), M)                # (GM,)
    blockmask = (col_group[:, None] == col_group[None, :]).astype(jnp.float32) \
        * m1flat[None, :]                                                    # (GM, GM)
    sel = (jnp.arange(G, dtype=jnp.int32)[:, None] == col_group[None, :]).astype(jnp.float32) \
        * (mask1 * mask_eq).reshape(GM)[None, :]                             # (G, GM)
    mask2 = (new_user_ids[None, :] == user_ids[:, None]).astype(jnp.float32)  # (B, G)

    return pl.pallas_call(
        _fused_han_kernel,
        out_shape=jax.ShapeDtypeStruct((Bsz, d), jnp.float32),
        input_output_aliases={6: 0},   # final result overwrites the ufull buffer
    )(menb_flat, m1col, blockmask, sel, nue, mask2, ufull,
      wqkv, bqkv, w1, b1, w2, b2)


@jax.jit
def _fixed_agg_forward_arrays(u2e_w, g2e_w, user_ids, menb_ids, mask):
    ufull = u2e_w[user_ids]                                     # (B, D)
    menb_emb = g2e_w[menb_ids] * mask[..., None]                # (B, M, D)
    M = menb_ids.shape[1]
    # TODO(synk): torch.median (lower-median, sort-based) has no clean Pallas equivalent;
    #             reproduced with a plain-JAX sort (torch returns sorted[(n-1)//2] on dim=1).
    med = jnp.sort(menb_emb, axis=1)[:, (M - 1) // 2, :]        # (B, D)
    return ufull + med


# ----------------------------------------------------------------------------
# Forward pass (Python glue: dict lookups, ragged padding)
# ----------------------------------------------------------------------------
def get_keys(d, value):
    return [k for k, v in d.items() if value in v]


def user_aggregator_forward(user_inputs, item_inputs, type_a, params,
                            u_groups_dict, group_member_dict):
    del item_inputs  # unused by the reference forward()
    user_ids = list(user_inputs)
    user_ids_arr = jnp.array(user_ids, dtype=jnp.int32)

    if type_a == "han":
        user_inputs_keys = [get_keys(group_member_dict, u) for u in user_ids]
        new_user_inputs = [u for u, keys in zip(user_ids, user_inputs_keys) for _ in keys]
        group_input = [g for keys in user_inputs_keys for g in keys]
        group_user_ids = [group_member_dict[k] for k in group_input]
        M = max(len(m) for m in group_user_ids)
        menb_ids = jnp.array([m + [0] * (M - len(m)) for m in group_user_ids],
                             dtype=jnp.int32)                                 # (G, M)
        mask1 = jnp.array([[1.0] * len(m) + [0.0] * (M - len(m)) for m in group_user_ids],
                          dtype=jnp.float32)                                  # (G, M)
        new_user_arr = jnp.array(new_user_inputs, dtype=jnp.int32)            # (G,)
        return _han_forward_arrays(params["u2e"], user_ids_arr, menb_ids, mask1, new_user_arr,
                                   params["wqkv"], params["bqkv"],
                                   params["w1"], params["b1"], params["w2"], params["b2"])

    if type_a == "fixed_agg":
        groups_ids = [u_groups_dict[u] for u in user_ids]
        M = max(len(g) for g in groups_ids)
        menb_ids = jnp.array([g + [0] * (M - len(g)) for g in groups_ids], dtype=jnp.int32)
        mask = jnp.array([[1.0] * len(g) + [0.0] * (M - len(g)) for g in groups_ids],
                         dtype=jnp.float32)
        return _fixed_agg_forward_arrays(params["u2e"], params["g2e"], user_ids_arr,
                                         menb_ids, mask)

    raise ValueError(f"unknown type_a: {type_a}")


# ----------------------------------------------------------------------------
# Deterministic parameter init
# ----------------------------------------------------------------------------
def build_params():
    keys = jax.random.split(jax.random.PRNGKey(0), 12)
    n = lambda k, s, scale=0.1: (scale * jax.random.normal(k, s)).astype(jnp.float32)
    wq, bq = n(keys[2], (D, D)), n(keys[3], (1, D))
    wk, bk = n(keys[4], (D, D)), n(keys[5], (1, D))
    wv, bv = n(keys[6], (D, D)), n(keys[7], (1, D))
    return {
        "u2e": n(keys[0], (NUM_USERS, D)),
        "g2e": n(keys[1], (NUM_GROUPS, D)),
        # SelfAttentionLayer_tuser Q/K/V Linear(D,D), packed as one (D, 3D) weight/bias.
        "wqkv": jnp.concatenate([wq, wk, wv], axis=1),
        "bqkv": jnp.concatenate([bq, bk, bv], axis=1),
        # AttentionLayer(D): Linear(D,16) -> ReLU -> Linear(16,1)
        "w1": n(keys[8], (D, ATT_H)), "b1": n(keys[9], (1, ATT_H)),
        "w2": n(keys[10], (1, ATT_H)),          # stored as a row; used via mul + lane-sum
        "b2": n(keys[11], (1, 1)),
    }


if __name__ == "__main__":
    group_member_dict = {
        0: [0, 1, 2, 3],
        1: [1, 4, 5],
        2: [2, 6],
        3: [0, 7, 8, 9],
        4: [3, 5, 10],
        5: [4, 11],
    }
    u_groups_dict = {u: [g for g, members in group_member_dict.items() if u in members]
                     for u in range(NUM_USERS)}

    user_inputs = [0, 3, 5, 11]     # batch of 4 users
    item_inputs = [1, 2, 3, 4]      # unused by forward (parity with the reference signature)

    params = build_params()

    out_han = user_aggregator_forward(user_inputs, item_inputs, "han",
                                      params, u_groups_dict, group_member_dict)
    out_fixed = user_aggregator_forward(user_inputs, item_inputs, "fixed_agg",
                                        params, u_groups_dict, group_member_dict)

    jax.block_until_ready(out_han)
    jax.block_until_ready(out_fixed)
    assert out_han.shape == (len(user_inputs), D)
    assert out_fixed.shape == (len(user_inputs), D)
    assert bool(jnp.all(jnp.isfinite(out_han)))
    assert bool(jnp.all(jnp.isfinite(out_fixed)))
    print("KERNEL_OK")
</pallas_src>

<mosaic_0001>
module attributes {stable_mosaic.version = 11 : i64} {
  func.func @_fused_han_kernel(%arg0: memref<28x32xf32, #tpu.memory_space<vmem>>, %arg1: memref<28x1xf32, #tpu.memory_space<vmem>>, %arg2: memref<28x28xf32, #tpu.memory_space<vmem>>, %arg3: memref<7x28xf32, #tpu.memory_space<vmem>>, %arg4: memref<7x32xf32, #tpu.memory_space<vmem>>, %arg5: memref<4x7xf32, #tpu.memory_space<vmem>>, %arg6: memref<4x32xf32, #tpu.memory_space<vmem>>, %arg7: memref<32x96xf32, #tpu.memory_space<vmem>>, %arg8: memref<1x96xf32, #tpu.memory_space<vmem>>, %arg9: memref<32x16xf32, #tpu.memory_space<vmem>>, %arg10: memref<1x16xf32, #tpu.memory_space<vmem>>, %arg11: memref<1x16xf32, #tpu.memory_space<vmem>>, %arg12: memref<1x1xf32, #tpu.memory_space<vmem>>, %arg13: memref<4x32xf32, #tpu.memory_space<vmem>>) attributes {dimension_semantics = [], scalar_prefetch = 0 : i64, scratch_operands = 0 : i64, tpu.core_type = #tpu.core_type<tc>} {
    %c0 = arith.constant 0 : index
    %c0_0 = arith.constant 0 : index
    %0 = vector.load %arg1[%c0, %c0_0] : memref<28x1xf32, #tpu.memory_space<vmem>>, vector<28x1xf32>
    %c0_1 = arith.constant 0 : index
    %c0_2 = arith.constant 0 : index
    %1 = vector.load %arg0[%c0_1, %c0_2] : memref<28x32xf32, #tpu.memory_space<vmem>>, vector<28x32xf32>
    %2 = vector.broadcast %0 : vector<28x1xf32> to vector<28x32xf32>
    %3 = arith.mulf %1, %2 : vector<28x32xf32>
    %c0_3 = arith.constant 0 : index
    %c0_4 = arith.constant 0 : index
    %4 = vector.load %arg7[%c0_3, %c0_4] : memref<32x96xf32, #tpu.memory_space<vmem>>, vector<32x96xf32>
    %cst = arith.constant dense<0.000000e+00> : vector<28x96xf32>
    %5 = tpu.matmul %3, %4, %cst {dimension_numbers = #tpu.dot_dimension_numbers<[1], [0], [0], [1], [0, 0, 1, 1], [], []>} : vector<28x32xf32>, vector<32x96xf32>, vector<28x96xf32> -> vector<28x96xf32>
    %c0_5 = arith.constant 0 : index
    %c0_6 = arith.constant 0 : index
    %6 = vector.load %arg8[%c0_5, %c0_6] : memref<1x96xf32, #tpu.memory_space<vmem>>, vector<1x96xf32>
    %7 = vector.broadcast %6 : vector<1x96xf32> to vector<28x96xf32>
    %8 = arith.addf %5, %7 : vector<28x96xf32>
    %9 = vector.extract_strided_slice %8 {offsets = [0, 0], sizes = [28, 32], strides = [1, 1]} : vector<28x96xf32> to vector<28x32xf32>
    %10 = vector.broadcast %0 : vector<28x1xf32> to vector<28x32xf32>
    %11 = arith.mulf %9, %10 : vector<28x32xf32>
    %12 = vector.extract_strided_slice %8 {offsets = [0, 32], sizes = [28, 32], strides = [1, 1]} : vector<28x96xf32> to vector<28x32xf32>
    %13 = vector.broadcast %0 : vector<28x1xf32> to vector<28x32xf32>
    %14 = arith.mulf %12, %13 : vector<28x32xf32>
    %15 = vector.extract_strided_slice %8 {offsets = [0, 64], sizes = [28, 32], strides = [1, 1]} : vector<28x96xf32> to vector<28x32xf32>
    %cst_7 = arith.constant dense<0.000000e+00> : vector<28x28xf32>
    %16 = tpu.matmul %11, %14, %cst_7 {dimension_numbers = #tpu.dot_dimension_numbers<[1], [1], [0], [0], [0, 0, 1, 0], [], []>} : vector<28x32xf32>, vector<28x32xf32>, vector<28x28xf32> -> vector<28x28xf32>
    %cst_8 = arith.constant 0.176776692 : f32
    %17 = vector.broadcast %cst_8 : f32 to vector<28x28xf32>
    %18 = arith.mulf %16, %17 : vector<28x28xf32>
    %cst_9 = arith.constant -5.000000e+01 : f32
    %cst_10 = arith.constant 5.000000e+01 : f32
    %19 = vector.broadcast %cst_9 : f32 to vector<28x28xf32>
    %20 = arith.maximumf %19, %18 : vector<28x28xf32>
    %21 = vector.broadcast %cst_10 : f32 to vector<28x28xf32>
    %22 = arith.minimumf %21, %20 : vector<28x28xf32>
    %23 = math.exp %22 : vector<28x28xf32>
    %c0_11 = arith.constant 0 : index
    %c0_12 = arith.constant 0 : index
    %24 = vector.load %arg2[%c0_11, %c0_12] : memref<28x28xf32, #tpu.memory_space<vmem>>, vector<28x28xf32>
    %25 = arith.mulf %23, %24 : vector<28x28xf32>
    %cst_13 = arith.constant dense<0.000000e+00> : vector<28xf32>
    %26 = vector.multi_reduction <add>, %25, %cst_13 [1] : vector<28x28xf32> to vector<28xf32>
    %27 = vector.shape_cast %26 : vector<28xf32> to vector<28x1xf32>
    %28 = tpu.reciprocal %27 {approx = true} : vector<28x1xf32> -> vector<28x1xf32>
    %29 = vector.broadcast %28 : vector<28x1xf32> to vector<28x28xf32>
    %30 = arith.mulf %25, %29 : vector<28x28xf32>
    %cst_14 = arith.constant dense<0.000000e+00> : vector<28x32xf32>
    %31 = tpu.matmul %30, %15, %cst_14 {dimension_numbers = #tpu.dot_dimension_numbers<[1], [0], [0], [1], [0, 0, 1, 1], [], []>} : vector<28x28xf32>, vector<28x32xf32>, vector<28x32xf32> -> vector<28x32xf32>
    %c0_15 = arith.constant 0 : index
    %c0_16 = arith.constant 0 : index
    %32 = vector.load %arg3[%c0_15, %c0_16] : memref<7x28xf32, #tpu.memory_space<vmem>>, vector<7x28xf32>
    %cst_17 = arith.constant dense<0.000000e+00> : vector<7x32xf32>
    %33 = tpu.matmul %32, %31, %cst_17 {dimension_numbers = #tpu.dot_dimension_numbers<[1], [0], [0], [1], [0, 0, 1, 1], [], []>} : vector<7x28xf32>, vector<28x32xf32>, vector<7x32xf32> -> vector<7x32xf32>
    %cst_18 = arith.constant 5.000000e-01 : f32
    %34 = vector.broadcast %cst_18 : f32 to vector<7x32xf32>
    %35 = arith.mulf %34, %33 : vector<7x32xf32>
    %c0_19 = arith.constant 0 : index
    %c0_20 = arith.constant 0 : index
    %36 = vector.load %arg4[%c0_19, %c0_20] : memref<7x32xf32, #tpu.memory_space<vmem>>, vector<7x32xf32>
    %cst_21 = arith.constant 5.000000e-01 : f32
    %37 = vector.broadcast %cst_21 : f32 to vector<7x32xf32>
    %38 = arith.mulf %37, %36 : vector<7x32xf32>
    %39 = arith.addf %35, %38 : vector<7x32xf32>
    %c0_22 = arith.constant 0 : index
    %c0_23 = arith.constant 0 : index
    %40 = vector.load %arg9[%c0_22, %c0_23] : memref<32x16xf32, #tpu.memory_space<vmem>>, vector<32x16xf32>
    %cst_24 = arith.constant dense<0.000000e+00> : vector<7x16xf32>
    %41 = tpu.matmul %39, %40, %cst_24 {dimension_numbers = #tpu.dot_dimension_numbers<[1], [0], [0], [1], [0, 0, 1, 1], [], []>} : vector<7x32xf32>, vector<32x16xf32>, vector<7x16xf32> -> vector<7x16xf32>
    %c0_25 = arith.constant 0 : index
    %c0_26 = arith.constant 0 : index
    %42 = vector.load %arg10[%c0_25, %c0_26] : memref<1x16xf32, #tpu.memory_space<vmem>>, vector<1x16xf32>
    %43 = vector.broadcast %42 : vector<1x16xf32> to vector<7x16xf32>
    %44 = arith.addf %41, %43 : vector<7x16xf32>
    %cst_27 = arith.constant 0.000000e+00 : f32
    %45 = vector.broadcast %cst_27 : f32 to vector<7x16xf32>
    %46 = arith.maximumf %44, %45 : vector<7x16xf32>
    %c0_28 = arith.constant 0 : index
    %c0_29 = arith.constant 0 : index
    %47 = vector.load %arg11[%c0_28, %c0_29] : memref<1x16xf32, #tpu.memory_space<vmem>>, vector<1x16xf32>
    %48 = vector.broadcast %47 : vector<1x16xf32> to vector<7x16xf32>
    %49 = arith.mulf %46, %48 : vector<7x16xf32>
    %cst_30 = arith.constant dense<0.000000e+00> : vector<7xf32>
    %50 = vector.multi_reduction <add>, %49, %cst_30 [1] : vector<7x16xf32> to vector<7xf32>
    %51 = vector.shape_cast %50 : vector<7xf32> to vector<7x1xf32>
    %c0_31 = arith.constant 0 : index
    %c0_32 = arith.constant 0 : index
    %52 = vector.load %arg12[%c0_31, %c0_32] : memref<1x1xf32, #tpu.memory_space<vmem>>, vector<1x1xf32>
    %53 = vector.broadcast %52 : vector<1x1xf32> to vector<7x1xf32>
    %54 = arith.addf %51, %53 : vector<7x1xf32>
    %cst_33 = arith.constant dense<0xFF800000> : vector<1xf32>
    %55 = vector.multi_reduction <maximumf>, %54, %cst_33 [0] : vector<7x1xf32> to vector<1xf32>
    %56 = vector.shape_cast %55 : vector<1xf32> to vector<1x1xf32>
    %57 = vector.broadcast %56 : vector<1x1xf32> to vector<7x1xf32>
    %58 = arith.subf %54, %57 : vector<7x1xf32>
    %59 = math.exp %58 : vector<7x1xf32>
    %cst_34 = arith.constant dense<0.000000e+00> : vector<1xf32>
    %60 = vector.multi_reduction <add>, %59, %cst_34 [0] : vector<7x1xf32> to vector<1xf32>
    %61 = vector.shape_cast %60 : vector<1xf32> to vector<1x1xf32>
    %62 = tpu.reciprocal %61 {approx = true} : vector<1x1xf32> -> vector<1x1xf32>
    %63 = vector.broadcast %62 : vector<1x1xf32> to vector<7x1xf32>
    %64 = arith.mulf %59, %63 : vector<7x1xf32>
    %c0_35 = arith.constant 0 : index
    %c0_36 = arith.constant 0 : index
    %65 = vector.load %arg5[%c0_35, %c0_36] : memref<4x7xf32, #tpu.memory_space<vmem>>, vector<4x7xf32>
    %66 = vector.broadcast %64 : vector<7x1xf32> to vector<7x32xf32>
    %67 = arith.mulf %66, %39 : vector<7x32xf32>
    %cst_37 = arith.constant dense<0.000000e+00> : vector<4x32xf32>
    %68 = tpu.matmul %65, %67, %cst_37 {dimension_numbers = #tpu.dot_dimension_numbers<[1], [0], [0], [1], [0, 0, 1, 1], [], []>} : vector<4x7xf32>, vector<7x32xf32>, vector<4x32xf32> -> vector<4x32xf32>
    %c0_38 = arith.constant 0 : index
    %c0_39 = arith.constant 0 : index
    %69 = vector.load %arg5[%c0_38, %c0_39] : memref<4x7xf32, #tpu.memory_space<vmem>>, vector<4x7xf32>
    %cst_40 = arith.constant dense<0.000000e+00> : vector<4x1xf32>
    %70 = tpu.matmul %69, %64, %cst_40 {dimension_numbers = #tpu.dot_dimension_numbers<[1], [0], [0], [1], [0, 0, 1, 1], [], []>} : vector<4x7xf32>, vector<7x1xf32>, vector<4x1xf32> -> vector<4x1xf32>
    %cst_41 = arith.constant 1.000000e-30 : f32
    %71 = vector.broadcast %cst_41 : f32 to vector<4x1xf32>
    %72 = arith.maximumf %70, %71 : vector<4x1xf32>
    %73 = tpu.reciprocal %72 {approx = true} : vector<4x1xf32> -> vector<4x1xf32>
    %74 = vector.broadcast %73 : vector<4x1xf32> to vector<4x32xf32>
    %75 = arith.mulf %68, %74 : vector<4x32xf32>
    %cst_42 = arith.constant 5.000000e-01 : f32
    %76 = vector.broadcast %cst_42 : f32 to vector<4x32xf32>
    %77 = arith.mulf %76, %75 : vector<4x32xf32>
    %c0_43 = arith.constant 0 : index
    %c0_44 = arith.constant 0 : index
    %78 = vector.load %arg6[%c0_43, %c0_44] : memref<4x32xf32, #tpu.memory_space<vmem>>, vector<4x32xf32>
    %cst_45 = arith.constant 5.000000e-01 : f32
    %79 = vector.broadcast %cst_45 : f32 to vector<4x32xf32>
    %80 = arith.mulf %79, %78 : vector<4x32xf32>
    %81 = arith.addf %77, %80 : vector<4x32xf32>
    %c0_46 = arith.constant 0 : index
    %c0_47 = arith.constant 0 : index
    %82 = vector.load %arg13[%c0_46, %c0_47] : memref<4x32xf32, #tpu.memory_space<vmem>>, vector<4x32xf32>
    tpu.vector_store %arg13[%c0_46, %c0_47], %81 {strides = array<i32>} : memref<4x32xf32, #tpu.memory_space<vmem>>, vector<4x32xf32>,
    return
  }
}

</mosaic_0001>

<bundles_post_ra>
// kernel: mul.15
= control target key start
LH: loop header
LB: loop body
LE: loop exit
PB: predicated region body
PF: predicated region fallthrough
CT: control target
= control target key end

     0   :  { %s59_s10 = smov 24   ;;  %s60_s11 = smov 16   ;;  %vm3_vm0 = vcmask 31744   ;;  %vm9_vm1 = vcmask 228544   ;;  %vm15_vm2 = vcmask 195744   ;;  %vm21_vm3 = vcmask 162944   ;;  %s99_s0 = inlined_call_operand.vmem [shape: f32[7,4], index: 0, kind: input, shape index: {}]   ;;  %s100_s1 = inlined_call_operand.vmem [shape: f32[28], index: 1, kind: output, shape index: {}]  }
   0x1   :  { %v47_v0 = vld [vmem:[%s99_s0 + $0x6] sm:$0x1]   ;;  %v49_v1 = vld [vmem:[%s99_s0 + $0x4] sm:$0x1]   ;;  %v51_v2 = vld [vmem:[%s99_s0 + $0x2] sm:$0x1]  }
   0x2   :  { %7 = vrot.lane.b32.xlu0 %v47_v0, %s59_s10  ;;  %19 = vrot.lane.b32.xlu1 %v49_v1, %s60_s11  ;;  %s61_s14 = smov 8   ;;  %v48_v3 = vld [vmem:[%s99_s0 + $0x5] sm:$0x1]   ;;  %v50_v4 = vld [vmem:[%s99_s0 + $0x3] sm:$0x1]   ;;  %s62_s21 = smov 20  }
   0x3   :  { %31 = vrot.lane.b32.xlu2 %v51_v2, %s61_s14  ;;  %v52_v5 = vld [vmem:[%s99_s0 + $0x1] sm:$0x1]   ;;  %s63_s22 = smov 12   ;;  %s64_s23 = smov 4   ;;  %v2_v6 = vld [vmem:[%s99_s0] sm:$0x1]  }
   0x4   :  { %4 = vst.msk [vmem:[#allocation0] sm:$0x1] %vm3_vm0, %v2_v6   ;;  %vm27_vm4 = vcmask 130144   ;;  %vm33_vm5 = vcmask 97344   ;;  %vm39_vm6 = vcmask 64544  }
   0xa   :  { %13 = vrot.lane.b32.xlu0 %v48_v3, %s62_s21  ;;  %25 = vrot.lane.b32.xlu1 %v50_v4, %s63_s22 }
   0xb   :  { %37 = vrot.lane.b32.xlu2 %v52_v5, %s64_s23 }
  0x5d   :  { %v32_v7 = vpop.permute.xlu2 %31  }
  0x65   :  { %v38_v8 = vpop.permute.xlu2 %37  }
  0x74   :  { %v8_v9 = vpop.permute.xlu0 %7   ;;  %v20_v10 = vpop.permute.xlu1 %19  }
  0x75   :  { %10 = vst.msk [vmem:[#allocation0] sm:$0x1] %vm9_vm1, %v8_v9  }
  0x7c   :  { %v14_v11 = vpop.permute.xlu0 %13   ;;  %v26_v12 = vpop.permute.xlu1 %25  }
  0x7d   :  { %16 = vst.msk [vmem:[#allocation0] sm:$0x1] %vm15_vm2, %v14_v11  }
  0x7e   :  { %22 = vst.msk [vmem:[#allocation0] sm:$0x1] %vm21_vm3, %v20_v10  }
  0x7f   :  { %28 = vst.msk [vmem:[#allocation0] sm:$0x1] %vm27_vm4, %v26_v12  }
  0x80   :  { %34 = vst.msk [vmem:[#allocation0] sm:$0x1] %vm33_vm5, %v32_v7  }
  0x81   :  { %40 = vst.msk [vmem:[#allocation0] sm:$0x1] %vm39_vm6, %v38_v8  }
  0x88   :  { %v43_v13 = vld [vmem:[#allocation0] sm:$0x1] }
  0x89   :  { %46 = vst [vmem:[%s100_s1] sm:$0x1] %v43_v13 }

// kernel: eq.30
= control target key start
LH: loop header
LB: loop body
LE: loop exit
PB: predicated region body
PF: predicated region fallthrough
CT: control target
= control target key end

     0   :  { %s59_s10 = smov 24   ;;  %s60_s11 = smov 16   ;;  %vm3_vm0 = vcmask 31744   ;;  %vm9_vm1 = vcmask 228544   ;;  %vm15_vm2 = vcmask 195744   ;;  %vm21_vm3 = vcmask 162944   ;;  %s99_s0 = inlined_call_operand.vmem [shape: s32[7,4], index: 0, kind: input, shape index: {}]   ;;  %s100_s1 = inlined_call_operand.vmem [shape: s32[28], index: 1, kind: output, shape index: {}]  }
   0x1   :  { %v47_v0 = vld [vmem:[%s99_s0 + $0x6] sm:$0x1]   ;;  %v49_v1 = vld [vmem:[%s99_s0 + $0x4] sm:$0x1]   ;;  %v51_v2 = vld [vmem:[%s99_s0 + $0x2] sm:$0x1]  }
   0x2   :  { %7 = vrot.lane.b32.xlu0 %v47_v0, %s59_s10  ;;  %19 = vrot.lane.b32.xlu1 %v49_v1, %s60_s11  ;;  %s61_s14 = smov 8   ;;  %v48_v3 = vld [vmem:[%s99_s0 + $0x5] sm:$0x1]   ;;  %v50_v4 = vld [vmem:[%s99_s0 + $0x3] sm:$0x1]   ;;  %s62_s21 = smov 20  }
   0x3   :  { %31 = vrot.lane.b32.xlu2 %v51_v2, %s61_s14  ;;  %v52_v5 = vld [vmem:[%s99_s0 + $0x1] sm:$0x1]   ;;  %s63_s22 = smov 12   ;;  %s64_s23 = smov 4   ;;  %v2_v6 = vld [vmem:[%s99_s0] sm:$0x1]  }
   0x4   :  { %4 = vst.msk [vmem:[#allocation0] sm:$0x1] %vm3_vm0, %v2_v6   ;;  %vm27_vm4 = vcmask 130144   ;;  %vm33_vm5 = vcmask 97344   ;;  %vm39_vm6 = vcmask 64544  }
   0xa   :  { %13 = vrot.lane.b32.xlu0 %v48_v3, %s62_s21  ;;  %25 = vrot.lane.b32.xlu1 %v50_v4, %s63_s22 }
   0xb   :  { %37 = vrot.lane.b32.xlu2 %v52_v5, %s64_s23 }
  0x5d   :  { %v32_v7 = vpop.permute.xlu2 %31  }
  0x65   :  { %v38_v8 = vpop.permute.xlu2 %37  }
  0x74   :  { %v8_v9 = vpop.permute.xlu0 %7   ;;  %v20_v10 = vpop.permute.xlu1 %19  }
  0x75   :  { %10 = vst.msk [vmem:[#allocation0] sm:$0x1] %vm9_vm1, %v8_v9  }
  0x7c   :  { %v14_v11 = vpop.permute.xlu0 %13   ;;  %v26_v12 = vpop.permute.xlu1 %25  }
  0x7d   :  { %16 = vst.msk [vmem:[#allocation0] sm:$0x1] %vm15_vm2, %v14_v11  }
  0x7e   :  { %22 = vst.msk [vmem:[#allocation0] sm:$0x1] %vm21_vm3, %v20_v10  }
  0x7f   :  { %28 = vst.msk [vmem:[#allocation0] sm:$0x1] %vm27_vm4, %v26_v12  }
  0x80   :  { %34 = vst.msk [vmem:[#allocation0] sm:$0x1] %vm33_vm5, %v32_v7  }
  0x81   :  { %40 = vst.msk [vmem:[#allocation0] sm:$0x1] %vm39_vm6, %v38_v8  }
  0x88   :  { %v43_v13 = vld [vmem:[#allocation0] sm:$0x1] }
  0x89   :  { %46 = vst [vmem:[%s100_s1] sm:$0x1] %v43_v13 }

// kernel: _han_forward_arrays.1
= control target key start
LH: loop header
LB: loop body
LE: loop exit
PB: predicated region body
PF: predicated region fallthrough
CT: control target
= control target key end

     0   :  { %s802_s0 = inlined_call_operand.vmem [shape: f32[28,32], index: 0, kind: input, shape index: {}]   ;;  %s803_s1 = inlined_call_operand.vmem [shape: f32[28,1], index: 1, kind: input, shape index: {}]   ;;  %s804_s2 = inlined_call_operand.vmem [shape: f32[28,28], index: 2, kind: input, shape index: {}]   ;;  %s805_s3 = inlined_call_operand.vmem [shape: f32[7,28], index: 3, kind: input, shape index: {}]   ;;  %s806_s4 = inlined_call_operand.vmem [shape: f32[7,32], index: 4, kind: input, shape index: {}]   ;;  %s807_s5 = inlined_call_operand.vmem [shape: f32[4,7], index: 5, kind: input, shape index: {}]   ;;  %s808_s6 = inlined_call_operand.hbm [shape: f32[4,32], index: 6, kind: input, shape index: {}, may-alias: {6,13}]   ;;  %s809_s7 = inlined_call_operand.vmem [shape: f32[32,96], index: 7, kind: input, shape index: {}]   ;;  %s810_s8 = inlined_call_operand.vmem [shape: f32[1,96], index: 8, kind: input, shape index: {}]   ;;  %s811_s9 = inlined_call_operand.vmem [shape: f32[32,16], index: 9, kind: input, shape index: {}]   ;;  %s812_s10 = inlined_call_operand.vmem [shape: f32[1,16], index: 10, kind: input, shape index: {}]   ;;  %s813_s11 = inlined_call_operand.vmem [shape: f32[1,16], index: 11, kind: input, shape index: {}]   ;;  %s814_s12 = inlined_call_operand.<no memory space> [shape: f32[1,1], index: 12, kind: input, shape index: {}]   ;;  %s815_s13 = inlined_call_operand.hbm [shape: f32[4,32], index: 13, kind: output, shape index: {}, may-alias: {6,13}]  }
   0x1   :  { %v18_v0 = vstv %s814_s12 }
   0x2   :  { %19 = vst [vmem:[#allocation2] sm:$0x1] %v18_v0 }
   0x3   :  { %20 = vsyncpa [#allocation4], 0 }
   0x4   :  { %21 = vsyncpa [#allocation5], 0  ;;  %s39_s29 = sshll.u32 %s808_s6, 4  ;;  %s617_s30 = smov [#allocation3]   ;;  %s40_s29 = int_to_ptr.hbm [resolvable:$true] %s39_s29 }
   0x5   :  { %s41_s14 = sshll.u32 %s617_s30, 4  ;;  %s42_s14 = int_to_ptr.vmem [resolvable:$true] %s41_s14 }
   0x6   :  { %44 = dma.hbm_to_vmem [thread:$0]  %s40_s29, 64, %s42_s14, [#allocation4]  }
   0x7   :  { %613 = dma.done.wait [#allocation4], 64  }
   0x8   :  { %614 = vsyncadd [#allocation4], 4294967232  ;;  %v618_v1 = vmov 0   ;;  %v61_v2 = vld [vmem:[%s803_s1] sm:$0xff]  ;;  %v63_v3 = vld [vmem:[%s803_s1 + $0x10] sm:$0xff]  ;;  %vm101_vm0 = vcmask 261120  }
   0x9   :  { %531 = vset.pattern.permute.xlu0 %v618_v1  ;;  %532 = vset.pattern.permute.xlu1 %v618_v1  ;;  %v96_v4 = vld [vmem:[%s809_s7 + $0x18] sm:$0xff]  ;;  %v95_v5 = vld [vmem:[%s809_s7 + $0x10] sm:$0xff]  ;;  %v94_v6 = vld [vmem:[%s809_s7 + $0x8] sm:$0xff]  ;;  %s619_s18 = smov 96   ;;  %vm281_vm1 = vcmask 1043456   ;;  %vm232_vm2 = vcmask 228352  }
   0xa   :  { %538 = vset.pattern.permute.xlu2 %v618_v1  ;;  %71 = vperm.xlu0 %531, %v61_v2   ;;  %v62_v7 = vld [vmem:[%s803_s1 + $0x8] sm:$0xff]  ;;  %v64_v8 = vld [vmem:[%s803_s1 + $0x18] sm:$0xf]  ;;  %v93_v9 = vld [vmem:[%s809_s7] sm:$0xff]  ;;  %vm242_vm3 = vcmask 224256   ;;  %vm381_vm4 = vcmask 129024  }
   0xb   :  { %81 = vperm.xlu1 %532, %v63_v3   ;;  %126 = vmatpush.msra.mxu0 %v96_v4  ;;  %v65_v10 = vld [vmem:[%s802_s0] sm:$0xff]  ;;  %v66_v13 = vld [vmem:[%s802_s0 + $0x8] sm:$0xff]  ;;  %v67_v16 = vld [vmem:[%s802_s0 + $0x10] sm:$0xff]  ;;  %vm390_vm5 = vcmask 6144   ;;  %vm421_vm6 = vcmask 1046528   ;;  %vm417_vm7 = vcmask 56320  }
   0xc   :  { %v68_v19 = vld [vmem:[%s802_s0 + $0x18] sm:$0xf]  ;;  %v539_v22 = vld [vmem:[%s810_s8] ss:$0 sm:$0xff]  ;;  %s620_s0 = smov 64   ;;  %v225_v60 = vld [vmem:[%s804_s2 + $0x8] sm:$0xff] }
   0xd   :  { %127 = vmatpush.msra.mxu0 %v95_v5  ;;  %v224_v52 = vld [vmem:[%s804_s2] sm:$0xff]  ;;  %v226_v4 = vld [vmem:[%s804_s2 + $0x10] sm:$0xff]  ;;  %vm479_vm8 = vcmask 257024  }
   0xf   :  { %128 = vmatpush.msra.mxu0 %v94_v6 }
  0x11   :  { %129 = vmatpush.msra.mxu0 %v93_v9  ;;  %v227_v9 = vld [vmem:[%s804_s2 + $0x18] sm:$0xf] }
  0x12   :  { %76 = vperm.xlu0 %531, %v62_v7  }
  0x13   :  { %86 = vperm.xlu1 %532, %v64_v8  }
  0x7c   :  { %v72_v11 = vpop.permute.xlu0 %71 }
  0x7d   :  { %v89_v12 = vmul.f32 %v72_v11, %v65_v10  ;;  %v82_v17 = vpop.permute.xlu1 %81 }
  0x7e   :  { %v91_v18 = vmul.f32 %v82_v17, %v67_v16 }
  0x7f   :  { %498 = vmatmul.msk.f32.vlgmr.msra.gmra.mxu0 %vm101_vm0, %v89_v12 }
  0x84   :  { %v77_v14 = vpop.permute.xlu0 %76 }
  0x85   :  { %v90_v15 = vmul.f32 %v77_v14, %v66_v13  ;;  %v87_v20 = vpop.permute.xlu1 %86 }
  0x86   :  { %v92_v21 = vmul.f32 %v87_v20, %v68_v19 }
  0x87   :  { %499 = vmatmul.msk.f32.gmra.mxu0 %vm101_vm0, %v90_v15 }
  0x8f   :  { %500 = vmatmul.msk.f32.gmra.mxu0 %vm101_vm0, %v91_v18 }
  0x97   :  { %501 = vmatmul.msk.f32.gmra.mxu0 %vm101_vm0, %v92_v21 }
  0xfc   :  { %v131_v23 = vpop.f32.mrf.mxu0 }
  0xfd   :  { %v132_v24 = vadd.f32 %v539_v22, %v131_v23 }
  0xff   :  { %v143_v25 = vmul.f32 %v132_v24, %v72_v11 }
 0x101   :  { %151 = vrot.lane.b32.xlu1 %v143_v25, %s619_s18 }
 0x104   :  { %v134_v26 = vpop.f32.mrf.mxu0 }
 0x105   :  { %v135_v27 = vadd.f32 %v539_v22, %v134_v26 }
 0x107   :  { %v144_v28 = vmul.f32 %v135_v27, %v77_v14 }
 0x109   :  { %153 = vrot.lane.b32.xlu0 %v144_v28, %s619_s18 }
 0x10c   :  { %v137_v29 = vpop.f32.mrf.mxu0 }
 0x10d   :  { %v138_v30 = vadd.f32 %v539_v22, %v137_v29  ;;  %v313_v29 = vld [vmem:[%s805_s3] sm:$0x7f] }
 0x10f   :  { %v533_v31 = vpack.i.bf16 %v135_v27, %v138_v30  ;;  %v145_v35 = vmul.f32 %v138_v30, %v82_v17  ;;  %v347_v30 = vld [vmem:[%s811_s9 + $0x18] sm:$0xff] }
 0x111   :  { %534 = vrot.lane.b32.xlu1 %v533_v31, %s620_s0  ;;  %v346_v31 = vld [vmem:[%s811_s9 + $0x10] sm:$0xff] }
 0x114   :  { %v140_v32 = vpop.f32.mrf.mxu0 }
 0x115   :  { %v141_v33 = vadd.f32 %v539_v22, %v140_v32  ;;  %v345_v32 = vld [vmem:[%s811_s9 + $0x8] sm:$0xff] }
 0x117   :  { %264 = vrot.lane.b32.xlu0 %v141_v33, %s620_s0  ;;  %v146_v34 = vmul.f32 %v141_v33, %v87_v20  ;;  %v344_v33 = vld [vmem:[%s811_s9] sm:$0xff] }
 0x119   :  { %157 = vrot.lane.b32.xlu2 %v146_v34, %s619_s18  ;;  %258 = vrot.lane.b32.xlu1 %v132_v24, %s620_s0 }
 0x121   :  { %155 = vrot.lane.b32.xlu2 %v145_v35, %s619_s18 }
 0x173   :  { %v158_v36 = vpop.permute.xlu2 %157  ;;  %v152_v38 = vpop.permute.xlu1 %151 }
 0x174   :  { %502 = vmatpush.xpose.msk.msra.mxu1 %vm101_vm0, %v158_v36 }
 0x17b   :  { %v156_v37 = vpop.permute.xlu2 %155  ;;  %v154_v39 = vpop.permute.xlu0 %153 }
 0x17c   :  { %503 = vmatpush.xpose.msk.msra.mxu1 %vm101_vm0, %v156_v37 }
 0x180   :  { %504 = vmatpush.xpose.msk.msra.mxu1 %vm101_vm0, %v154_v39  ;;  %v540_v39 = vld [vmem:[%s812_s10] ss:$0 sm:$0xff]  ;;  %s621_s10 = smov [#allocation6]  }
 0x183   :  { %v535_v40 = vpop.permute.xlu1 %534 }
 0x184   :  { %505 = vmatpush.xpose.msk.msra.mxu1 %vm101_vm0, %v152_v38  ;;  %v536_v42 = vunpack.i.l.bf16 %v535_v40  ;;  %v537_v43 = vunpack.i.h.bf16 %v535_v40 }
 0x187   :  { %506 = vmatmul.msk.f32.vlgmr.msra.gmra.mxu1 %vm101_vm0, %v143_v25 }
 0x189   :  { %v265_v41 = vpop.permute.xlu0 %264 }
 0x18a   :  { %514 = vmatpush.msk.msra.mxu2 %vm281_vm1, %v265_v41 }
 0x18b   :  { %v259_v44 = vpop.permute.xlu1 %258 }
 0x18c   :  { %297 = vmatpush.msra.mxu2 %v536_v42  ;;  %v541_v42 = vld [vmem:[%s813_s11] ss:$0 sm:$0xff]  ;;  %s486_s11 = sshll.u32 %s621_s10, 4  ;;  %s487_s11 = int_to_ptr.vmem [resolvable:$true] %s486_s11 }
 0x18e   :  { %298 = vmatpush.msra.mxu2 %v537_v43 }
 0x18f   :  { %507 = vmatmul.msk.f32.gmra.mxu1 %vm101_vm0, %v144_v28 }
 0x190   :  { %299 = vmatpush.msra.mxu2 %v259_v44 }
 0x197   :  { %508 = vmatmul.msk.f32.gmra.mxu1 %vm101_vm0, %v145_v35 }
 0x19f   :  { %509 = vmatmul.msk.f32.gmra.mxu1 %vm101_vm0, %v146_v34  ;;  %v341_v34 = vld [vmem:[%s806_s4] sm:$0x7f] }
 0x1a0   :  { %v342_v35 = vmul.f32 0.5, %v341_v34 }
 0x204   :  { %v192_v45 = vpop.f32.mrf.mxu1 }
 0x205   :  { %v204_v46 = vmul.f32 0.17677669, %v192_v45 }
 0x207   :  { %v510_v47 = vclamps-f32 %v204_v46, 50.0  ;;  %v542_v46 = vld [vmem:[#allocation2] ss:$0 sm:$0xff] }
 0x209   :  { %v216_v48 = vmul.f32 1.442695, %v510_v47 }
 0x20b   :  { %543 = vpow2.f32 %v216_v48 }
 0x20c   :  { %v195_v49 = vpop.f32.mrf.mxu1 }
 0x20d   :  { %v205_v50 = vmul.f32 0.17677669, %v195_v49 }
 0x20f   :  { %v511_v51 = vclamps-f32 %v205_v50, 50.0 }
 0x211   :  { %v544_v53 = vpop.eup %543  ;;  %v218_v54 = vmul.f32 1.442695, %v511_v51 }
 0x212   :  { %v228_v55 = vmul.f32 %v544_v53, %v224_v52 }
 0x213   :  { %545 = vpow2.f32 %v218_v54 }
 0x214   :  { %v198_v56 = vpop.f32.mrf.mxu1  ;;  %v233_v57 = vsel %vm232_vm2, %v228_v55, 0.0 }
 0x215   :  { %v206_v58 = vmul.f32 0.17677669, %v198_v56  ;;  %234 = vadd.xlane.f32.xlu2 %v233_v57 }
 0x217   :  { %v512_v59 = vclamps-f32 %v206_v58, 50.0 }
 0x219   :  { %v546_v61 = vpop.eup %545  ;;  %v220_v62 = vmul.f32 1.442695, %v512_v59 }
 0x21a   :  { %v229_v63 = vmul.f32 %v546_v61, %v225_v60 }
 0x21b   :  { %547 = vpow2.f32 %v220_v62 }
 0x21c   :  { %v201_v0 = vpop.f32.mrf.mxu1  ;;  %v236_v1 = vsel %vm232_vm2, %v229_v63, 0.0 }
 0x21d   :  { %v207_v2 = vmul.f32 0.17677669, %v201_v0  ;;  %237 = vadd.xlane.f32.xlu0 %v236_v1 }
 0x21f   :  { %v513_v3 = vclamps-f32 %v207_v2, 50.0 }
 0x221   :  { %v548_v5 = vpop.eup %547  ;;  %v222_v6 = vmul.f32 1.442695, %v513_v3 }
 0x222   :  { %v230_v7 = vmul.f32 %v548_v5, %v226_v4 }
 0x223   :  { %549 = vpow2.f32 %v222_v6  ;;  %v410_v6 = vld [vmem:[%s807_s5] sm:$0xf]  ;;  %s488_s5 = sshll.u32 %s815_s13, 4  ;;  %s489_s5 = int_to_ptr.hbm [resolvable:$true] %s488_s5 }
 0x224   :  { %v239_v8 = vsel %vm232_vm2, %v230_v7, 0.0 }
 0x225   :  { %240 = vadd.xlane.f32.xlu1 %v239_v8 }
 0x229   :  { %v550_v10 = vpop.eup %549 }
 0x22a   :  { %v231_v11 = vmul.f32 %v550_v10, %v227_v9 }
 0x22c   :  { %v243_v12 = vsel %vm242_vm3, %v231_v11, 0.0 }
 0x22d   :  { %244 = vadd.xlane.f32.xlu2 %v243_v12 }
 0x288   :  { %v235_v13 = vpop.xlane.xlu2 %234 }
 0x289   :  { %551 = vrcp.f32 %v235_v13 }
 0x28f   :  { %v552_v14 = vpop.eup %551 }
 0x290   :  { %v238_v15 = vpop.xlane.xlu0 %237  ;;  %v250_v16 = vmul.f32 %v552_v14, %v228_v55 }
 0x291   :  { %553 = vrcp.f32 %v238_v15 }
 0x292   :  { %515 = vmatmul.msk.f32.vlgmr.msra.gmra.mxu2 %vm232_vm2, %v250_v16 }
 0x297   :  { %v554_v17 = vpop.eup %553 }
 0x298   :  { %v241_v18 = vpop.xlane.xlu1 %240  ;;  %v251_v19 = vmul.f32 %v554_v17, %v229_v63 }
 0x299   :  { %555 = vrcp.f32 %v241_v18 }
 0x29a   :  { %516 = vmatmul.msk.f32.gmra.mxu2 %vm232_vm2, %v251_v19 }
 0x29f   :  { %v556_v20 = vpop.eup %555 }
 0x2a0   :  { %v245_v21 = vpop.xlane.xlu2 %244  ;;  %v252_v22 = vmul.f32 %v556_v20, %v230_v7 }
 0x2a1   :  { %557 = vrcp.f32 %v245_v21 }
 0x2a2   :  { %517 = vmatmul.msk.f32.gmra.mxu2 %vm232_vm2, %v252_v22 }
 0x2a7   :  { %v558_v23 = vpop.eup %557 }
 0x2a8   :  { %v253_v24 = vmul.f32 %v558_v23, %v231_v11  ;;  %v476_v11 = vld [vmem:[#allocation3] sm:$0xf] }
 0x2a9   :  { %v477_v13 = vmul.f32 0.5, %v476_v11 }
 0x2aa   :  { %518 = vmatmul.msk.f32.gmra.mxu2 %vm232_vm2, %v253_v24 }
 0x315   :  { %v301_v25 = vpop.f32.mrf.mxu2 }
 0x31d   :  { %v304_v26 = vpop.f32.mrf.mxu2 }
 0x325   :  { %v307_v27 = vpop.f32.mrf.mxu2 }
 0x32d   :  { %v310_v28 = vpop.f32.mrf.mxu2 }
 0x32e   :  { %519 = vmatpush.msk.msra.mxu3 %vm281_vm1, %v310_v28 }
 0x330   :  { %333 = vmatpush.msra.mxu3 %v307_v27 }
 0x332   :  { %334 = vmatpush.msra.mxu3 %v304_v26 }
 0x334   :  { %335 = vmatpush.msra.mxu3 %v301_v25 }
 0x335   :  { %520 = vmatmul.msk.f32.vlgmr.msra.gmra.mxu3 %vm232_vm2, %v313_v29 }
 0x336   :  { %367 = vmatpush.msrb.mxu3 %v347_v30 }
 0x338   :  { %368 = vmatpush.msrb.mxu3 %v346_v31 }
 0x33a   :  { %369 = vmatpush.msrb.mxu3 %v345_v32 }
 0x33c   :  { %370 = vmatpush.msrb.mxu3 %v344_v33 }
 0x3b8   :  { %v337_v36 = vpop.f32.mrf.mxu3 }
 0x3b9   :  { %v340_v37 = vmul.f32 0.5, %v337_v36 }
 0x3bb   :  { %v343_v38 = vadd.f32 %v342_v35, %v340_v37 }
 0x3bd   :  { %521 = vmatmul.msk.f32.vlgmr.msrb.gmra.mxu3 %vm101_vm0, %v343_v38 }
 0x440   :  { %v372_v40 = vpop.f32.mrf.mxu3 }
 0x441   :  { %v373_v41 = vadd.f32 %v540_v39, %v372_v40 }
 0x443   :  { %v375_v43 = vmax.f32 %v373_v41, 0.0 }
 0x445   :  { %v380_v44 = vmul.f32 %v541_v42, %v375_v43 }
 0x447   :  { %v382_v45 = vsel %vm381_vm4, %v380_v44, 0.0 }
 0x448   :  { %383 = vadd.xlane.f32.xlu2 %v382_v45 }
 0x4bb   :  { %v384_v47 = vpop.xlane.xlu2 %383 }
 0x4bc   :  { %v389_v48 = vadd.f32 %v542_v46, %v384_v47 }
 0x4be   :  { %v391_v49 = vsel %vm390_vm5, %v389_v48, -inf }
 0x4bf   :  { %v392_v50 = vrot.slane %v391_v49, 4 }
 0x4c1   :  { %v393_v51 = vmax.f32 %v391_v49, %v392_v50 }
 0x4c3   :  { %v394_v52 = vrot.slane %v393_v51, 2 }
 0x4c5   :  { %v395_v53 = vmax.f32 %v393_v51, %v394_v52 }
 0x4c7   :  { %v396_v54 = vrot.slane %v395_v53, 1 }
 0x4c9   :  { %v397_v55 = vmax.f32 %v395_v53, %v396_v54 }
 0x4cb   :  { %v398_v56 = vsub.f32 %v389_v48, %v397_v55 }
 0x4cd   :  { %v399_v57 = vmul.f32 1.442695, %v398_v56 }
 0x4cf   :  { %559 = vpow2.f32 %v399_v57 }
 0x4d5   :  { %v560_v58 = vpop.eup %559 }
 0x4d6   :  { %v401_v59 = vsel %vm390_vm5, %v560_v58, 0.0 }
 0x4d7   :  { %v402_v60 = vrot.slane %v401_v59, 4 }
 0x4d9   :  { %v403_v61 = vadd.f32 %v402_v60, %v401_v59 }
 0x4db   :  { %v404_v62 = vrot.slane %v403_v61, 2 }
 0x4dd   :  { %v405_v63 = vadd.f32 %v404_v62, %v403_v61 }
 0x4df   :  { %v406_v0 = vrot.slane %v405_v63, 1 }
 0x4e1   :  { %v407_v1 = vadd.f32 %v406_v0, %v405_v63 }
 0x4e3   :  { %561 = vrcp.f32 %v407_v1 }
 0x4e9   :  { %v562_v2 = vpop.eup %561 }
 0x4ea   :  { %v409_v3 = vmul.f32 %v562_v2, %v560_v58 }
 0x4ec   :  { %413 = vperm.xlu2 %538, %v409_v3  }
 0x546   :  { %v414_v4 = vpop.permute.xlu2 %413 }
 0x547   :  { %v416_v5 = vmul.f32 %v414_v4, %v343_v38 }
 0x549   :  { %522 = vmatpush.msk.msra.mxu3 %vm421_vm6, %v416_v5 }
 0x54a   :  { %523 = vmatmul.msk.f32.vlgmr.msra.gmra.mxu3 %vm417_vm7, %v410_v6 }
 0x54b   :  { %524 = vmatpush.msk.msrb.mxu3 %vm421_vm6, %v409_v3 }
 0x552   :  { %525 = vmatmul.msk.f32.vlgmr.msrb.gmra.mxu3 %vm417_vm7, %v410_v6 }
 0x5cd   :  { %v442_v7 = vpop.f32.mrf.mxu3 }
 0x5d5   :  { %v464_v8 = vpop.f32.mrf.mxu3 }
 0x5d6   :  { %v467_v9 = vmax.f32 %v464_v8, 1e-30 }
 0x5d8   :  { %563 = vrcp.f32 %v467_v9 }
 0x5de   :  { %v564_v10 = vpop.eup %563 }
 0x5df   :  { %471 = vperm.xlu0 %531, %v564_v10  }
 0x651   :  { %v472_v12 = vpop.permute.xlu0 %471 }
 0x652   :  { %v474_v14 = vmul.f32 %v472_v12, %v442_v7 }
 0x654   :  { %v475_v15 = vmul.f32 0.5, %v474_v14 }
 0x656   :  { %v478_v16 = vadd.f32 %v477_v13, %v475_v15 }
 0x658   :  { %480 = vst.msk [vmem:[#allocation6] sm:$0xf] %vm479_vm8, %v478_v16 }
 0x659   :  { %491 = dma.vmem_to_hbm [thread:$0]  %s487_s11, 64, %s489_s5, [#allocation5]  }
 0x65a   :  { %615 = dma.done.wait [#allocation5], 64  }
 0x65b   :  { %616 = vsyncadd [#allocation5], 4294967232 }
 0x65c   :  { %496 = vsyncpa [#allocation4], 1 }
 0x65d   :  { %497 = vsyncpa [#allocation5], 1 }

</bundles_post_ra>
